<compile_context>
chip_gen: v5e
topology: v5e:2x2
jax: 0.10.0
libtpu: 0.0.40
codegen_flags: <defaults>
</compile_context>

<pallas_src>
import functools

import jax
import jax.numpy as jnp
from jax.experimental import pallas as pl
from jax.experimental.pallas import tpu as pltpu

_LANE = 128
_SUBLANE = 8
_MAX_ROWS_PER_BLOCK = 1024  # safe on every generation incl. v7x (64 MiB VMEM)


def _round_up(x, m):
    return (x + m - 1) // m * m


def _cdiv(a, b):
    return (a + b - 1) // b


def _actor_kernel(max_action, hidden, adp):
    """Kernel closure; max_action / hidden / adp are compile-time constants."""

    def kernel(x_ref, w1_ref, w2_ref, w3_ref, b_ref, o_ref):
        # Layer 1: Linear(state_dim -> 256) + ReLU  (bf16 MXU, f32 accumulate)
        h = jnp.dot(x_ref[...], w1_ref[...], preferred_element_type=jnp.float32)
        h = jnp.maximum(h + b_ref[0:1, :hidden], 0.0)

        # Layer 2: Linear(256 -> 256) + ReLU
        h = jnp.dot(h.astype(jnp.bfloat16), w2_ref[...],
                    preferred_element_type=jnp.float32)
        h = jnp.maximum(h + b_ref[1:2, :hidden], 0.0)

        # Layer 3: Linear(256 -> action_dim_padded), tanh, scale (padded cols = 0)
        h = jnp.dot(h.astype(jnp.bfloat16), w3_ref[...],
                    preferred_element_type=jnp.float32)
        h = h + b_ref[2:3, :adp]
        o_ref[...] = (max_action * jnp.tanh(h)).astype(o_ref.dtype)

    return kernel


def pack_actor_params(params):
    """One-time repack of f32 (in,out)-layout params for the kernel:
    bf16 weights, W3 zero-padded to a lane-dense 128-multiple output width,
    all biases fused into a single f32 (3, max(hidden, adp)) slab."""

    def as_row(b):
        return jnp.asarray(b, jnp.float32).reshape(1, -1)

    w1 = jnp.asarray(params["w1"], jnp.float32)          # (state_dim, 256)
    w2 = jnp.asarray(params["w2"], jnp.float32)          # (256, 256)
    w3 = jnp.asarray(params["w3"], jnp.float32)          # (256, action_dim)
    hidden = w1.shape[1]
    action_dim = w3.shape[1]
    adp = _round_up(action_dim, _LANE)

    w3p = jnp.zeros((w3.shape[0], adp), jnp.float32).at[:, :action_dim].set(w3)

    width = max(hidden, adp)
    bias = jnp.zeros((3, width), jnp.float32)
    bias = bias.at[0:1, :hidden].set(as_row(params["b1"]))
    bias = bias.at[1:2, :hidden].set(as_row(params["b2"]))
    bias = bias.at[2:3, :action_dim].set(as_row(params["b3"]))

    return {
        "w1": w1.astype(jnp.bfloat16),
        "w2": w2.astype(jnp.bfloat16),
        "w3": w3p.astype(jnp.bfloat16),
        "bias": bias,
    }


@functools.partial(jax.jit, static_argnames=("action_dim", "max_action", "out_dtype"))
def actor_forward(state, packed, action_dim, max_action, out_dtype="bfloat16"):
    """state: (B, state_dim) f32 (or bf16). packed: output of pack_actor_params.
    Returns (B, action_dim) in out_dtype (default bf16)."""
    w1, w2, w3, bias = packed["w1"], packed["w2"], packed["w3"], packed["bias"]
    B, state_dim = state.shape
    hidden = w1.shape[1]
    adp = w3.shape[1]
    odt = jnp.dtype(out_dtype)

    # Batch tiling: split B as evenly as possible into blocks of <=1024 rows,
    # force >=2 blocks once B >= 256 so both v7x TensorCores get work.
    min_blocks = 2 if B >= 256 else 1
    n_blocks = max(_cdiv(B, _MAX_ROWS_PER_BLOCK), min_blocks)
    tb = _round_up(_cdiv(B, n_blocks), _SUBLANE)
    b_pad = _round_up(B, tb)

    x = state.astype(jnp.bfloat16)            # cast once; halves streamed input DMA
    if b_pad != B:
        x = jnp.pad(x, ((0, b_pad - B), (0, 0)))   # minimal (< tb rows of) padding
    grid = (b_pad // tb,)

    flops = 2 * b_pad * (state_dim * hidden + hidden * hidden + hidden * adp)
    bytes_accessed = (b_pad * state_dim * 2 + w1.size * 2 + w2.size * 2 +
                      w3.size * 2 + bias.size * 4 + b_pad * adp * odt.itemsize)

    out = pl.pallas_call(
        _actor_kernel(float(max_action), hidden, adp),
        out_shape=jax.ShapeDtypeStruct((b_pad, adp), odt),
        grid_spec=pltpu.PrefetchScalarGridSpec(
            num_scalar_prefetch=0,
            grid=grid,
            in_specs=[
                # streamed per batch block (auto double-buffered)
                pl.BlockSpec((tb, state_dim), lambda i: (i, 0)),
                # weights / biases: constant block index -> VMEM-resident
                pl.BlockSpec((state_dim, hidden), lambda i: (0, 0)),
                pl.BlockSpec((hidden, hidden), lambda i: (0, 0)),
                pl.BlockSpec((hidden, adp), lambda i: (0, 0)),
                pl.BlockSpec(bias.shape, lambda i: (0, 0)),
            ],
            out_specs=pl.BlockSpec((tb, adp), lambda i: (i, 0)),
        ),
        compiler_params=pltpu.CompilerParams(
            dimension_semantics=("parallel",),
        ),
        cost_estimate=pl.CostEstimate(
            flops=flops,
            transcendentals=b_pad * adp,
            bytes_accessed=bytes_accessed,
        ),
    )(x, w1, w2, w3, bias)

    # Slice padded rows/lanes off (fuses into the consumer in most pipelines;
    # consumers that can index the padded slab should do so and skip this).
    return out[:B, :action_dim]


def init_actor_params(key, state_dim, action_dim, hidden=256):
    """Deterministic init mimicking PyTorch Linear default (uniform +/- 1/sqrt(fan_in)).
    Weights stored (in_features, out_features); biases (1, out_features)."""
    ks = jax.random.split(key, 6)

    def lin(kw, kb, fan_in, fan_out):
        bound = 1.0 / jnp.sqrt(jnp.float32(fan_in))
        w = jax.random.uniform(kw, (fan_in, fan_out), jnp.float32, -bound, bound)
        b = jax.random.uniform(kb, (1, fan_out), jnp.float32, -bound, bound)
        return w, b

    w1, b1 = lin(ks[0], ks[1], state_dim, hidden)
    w2, b2 = lin(ks[2], ks[3], hidden, hidden)
    w3, b3 = lin(ks[4], ks[5], hidden, action_dim)
    return {"w1": w1, "b1": b1, "w2": w2, "b2": b2, "w3": w3, "b3": b3}


def actor_reference(state, params, max_action):
    """Pure-JAX f32 reference (original PyTorch module semantics)."""
    h = jnp.maximum(state @ params["w1"] + params["b1"], 0.0)
    h = jnp.maximum(h @ params["w2"] + params["b2"], 0.0)
    return max_action * jnp.tanh(h @ params["w3"] + params["b3"])


if __name__ == "__main__":
    key = jax.random.PRNGKey(0)
    k_params, k_state = jax.random.split(key)

    batch = 2
    state_dim = 16
    action_dim = 8
    max_action = 2.0

    params = init_actor_params(k_params, state_dim, action_dim)
    packed = pack_actor_params(params)
    state = jax.random.normal(k_state, (batch, state_dim), jnp.float32)

    out = actor_forward(state, packed, action_dim, max_action)
    out = jax.block_until_ready(out)

    ref = actor_reference(state, params, max_action)
    assert out.shape == (batch, action_dim), out.shape
    # bf16 weights/activations/output (f32 accumulate & elementwise); tolerance
    # reflects that quantization against the f32 reference.
    assert jnp.allclose(out.astype(jnp.float32), ref, atol=5e-2, rtol=5e-2), \
        "mismatch vs f32 reference"

    print("KERNEL_OK")
</pallas_src>

<mosaic_0001>
module attributes {stable_mosaic.version = 11 : i64} {
  func.func @kernel(%arg0: i32, %arg1: memref<8x16xbf16, #tpu.memory_space<vmem>>, %arg2: memref<16x256xbf16, #tpu.memory_space<vmem>>, %arg3: memref<256x256xbf16, #tpu.memory_space<vmem>>, %arg4: memref<256x128xbf16, #tpu.memory_space<vmem>>, %arg5: memref<3x256xf32, #tpu.memory_space<vmem>>, %arg6: memref<8x128xbf16, #tpu.memory_space<vmem>>) attributes {dimension_semantics = [#tpu.dimension_semantics<parallel>], iteration_bounds = array<i64: 1>, scalar_prefetch = 0 : i64, scratch_operands = 0 : i64, tpu.core_type = #tpu.core_type<tc>, window_params = [{transform_indices = @transform_0, window_bounds = array<i64: 8, 16>}, {pipeline_mode = #tpu.pipeline_mode<synchronous>, transform_indices = @transform_1, window_bounds = array<i64: 16, 256>}, {pipeline_mode = #tpu.pipeline_mode<synchronous>, transform_indices = @transform_2, window_bounds = array<i64: 256, 256>}, {pipeline_mode = #tpu.pipeline_mode<synchronous>, transform_indices = @transform_3, window_bounds = array<i64: 256, 128>}, {pipeline_mode = #tpu.pipeline_mode<synchronous>, transform_indices = @transform_4, window_bounds = array<i64: 3, 256>}, {transform_indices = @transform_5, window_bounds = array<i64: 8, 128>}]} {
    %c0 = arith.constant 0 : index
    %c0_0 = arith.constant 0 : index
    %0 = vector.load %arg1[%c0, %c0_0] : memref<8x16xbf16, #tpu.memory_space<vmem>>, vector<8x16xbf16>
    %c0_1 = arith.constant 0 : index
    %c0_2 = arith.constant 0 : index
    %1 = vector.load %arg2[%c0_1, %c0_2] : memref<16x256xbf16, #tpu.memory_space<vmem>>, vector<16x256xbf16>
    %cst = arith.constant dense<0.000000e+00> : vector<8x256xf32>
    %2 = tpu.matmul %0, %1, %cst {dimension_numbers = #tpu.dot_dimension_numbers<[1], [0], [0], [1], [0, 0, 1, 1], [], []>} : vector<8x16xbf16>, vector<16x256xbf16>, vector<8x256xf32> -> vector<8x256xf32>
    %c0_3 = arith.constant 0 : index
    %c0_4 = arith.constant 0 : index
    %3 = vector.load %arg5[%c0_3, %c0_4] : memref<3x256xf32, #tpu.memory_space<vmem>>, vector<1x256xf32>
    %4 = vector.broadcast %3 : vector<1x256xf32> to vector<8x256xf32>
    %5 = arith.addf %2, %4 : vector<8x256xf32>
    %cst_5 = arith.constant 0.000000e+00 : f32
    %6 = vector.broadcast %cst_5 : f32 to vector<8x256xf32>
    %7 = arith.maximumf %5, %6 : vector<8x256xf32>
    %8 = arith.truncf %7 : vector<8x256xf32> to vector<8x256xbf16>
    %c0_6 = arith.constant 0 : index
    %c0_7 = arith.constant 0 : index
    %9 = vector.load %arg3[%c0_6, %c0_7] : memref<256x256xbf16, #tpu.memory_space<vmem>>, vector<256x256xbf16>
    %cst_8 = arith.constant dense<0.000000e+00> : vector<8x256xf32>
    %10 = tpu.matmul %8, %9, %cst_8 {dimension_numbers = #tpu.dot_dimension_numbers<[1], [0], [0], [1], [0, 0, 1, 1], [], []>} : vector<8x256xbf16>, vector<256x256xbf16>, vector<8x256xf32> -> vector<8x256xf32>
    %c1 = arith.constant 1 : index
    %c0_9 = arith.constant 0 : index
    %11 = vector.load %arg5[%c1, %c0_9] : memref<3x256xf32, #tpu.memory_space<vmem>>, vector<1x256xf32>
    %12 = vector.broadcast %11 : vector<1x256xf32> to vector<8x256xf32>
    %13 = arith.addf %10, %12 : vector<8x256xf32>
    %cst_10 = arith.constant 0.000000e+00 : f32
    %14 = vector.broadcast %cst_10 : f32 to vector<8x256xf32>
    %15 = arith.maximumf %13, %14 : vector<8x256xf32>
    %16 = arith.truncf %15 : vector<8x256xf32> to vector<8x256xbf16>
    %c0_11 = arith.constant 0 : index
    %c0_12 = arith.constant 0 : index
    %17 = vector.load %arg4[%c0_11, %c0_12] : memref<256x128xbf16, #tpu.memory_space<vmem>>, vector<256x128xbf16>
    %cst_13 = arith.constant dense<0.000000e+00> : vector<8x128xf32>
    %18 = tpu.matmul %16, %17, %cst_13 {dimension_numbers = #tpu.dot_dimension_numbers<[1], [0], [0], [1], [0, 0, 1, 1], [], []>} : vector<8x256xbf16>, vector<256x128xbf16>, vector<8x128xf32> -> vector<8x128xf32>
    %c2 = arith.constant 2 : index
    %c0_14 = arith.constant 0 : index
    %19 = vector.load %arg5[%c2, %c0_14] : memref<3x256xf32, #tpu.memory_space<vmem>>, vector<1x128xf32>
    %20 = vector.broadcast %19 : vector<1x128xf32> to vector<8x128xf32>
    %21 = arith.addf %18, %20 : vector<8x128xf32>
    %22 = math.tanh %21 : vector<8x128xf32>
    %cst_15 = arith.constant 2.000000e+00 : f32
    %23 = vector.broadcast %cst_15 : f32 to vector<8x128xf32>
    %24 = arith.mulf %23, %22 : vector<8x128xf32>
    %25 = arith.truncf %24 : vector<8x128xf32> to vector<8x128xbf16>
    %c0_16 = arith.constant 0 : index
    %c0_17 = arith.constant 0 : index
    %26 = vector.load %arg6[%c0_16, %c0_17] : memref<8x128xbf16, #tpu.memory_space<vmem>>, vector<8x128xbf16>
    tpu.vector_store %arg6[%c0_16, %c0_17], %25 {strides = array<i32>} : memref<8x128xbf16, #tpu.memory_space<vmem>>, vector<8x128xbf16>,
    return
  }
  func.func @transform_0(%arg0: i32) -> (i32, i32) {
    %c0_i32 = arith.constant 0 : i32
    %c0_i32_0 = arith.constant 0 : i32
    return %arg0, %c0_i32 : i32, i32
  }
  func.func @transform_1(%arg0: i32) -> (i32, i32) {
    %c0_i32 = arith.constant 0 : i32
    %c0_i32_0 = arith.constant 0 : i32
    %c0_i32_1 = arith.constant 0 : i32
    return %c0_i32, %c0_i32_0 : i32, i32
  }
  func.func @transform_2(%arg0: i32) -> (i32, i32) {
    %c0_i32 = arith.constant 0 : i32
    %c0_i32_0 = arith.constant 0 : i32
    %c0_i32_1 = arith.constant 0 : i32
    return %c0_i32, %c0_i32_0 : i32, i32
  }
  func.func @transform_3(%arg0: i32) -> (i32, i32) {
    %c0_i32 = arith.constant 0 : i32
    %c0_i32_0 = arith.constant 0 : i32
    %c0_i32_1 = arith.constant 0 : i32
    return %c0_i32, %c0_i32_0 : i32, i32
  }
  func.func @transform_4(%arg0: i32) -> (i32, i32) {
    %c0_i32 = arith.constant 0 : i32
    %c0_i32_0 = arith.constant 0 : i32
    %c0_i32_1 = arith.constant 0 : i32
    return %c0_i32, %c0_i32_0 : i32, i32
  }
  func.func @transform_5(%arg0: i32) -> (i32, i32) {
    %c0_i32 = arith.constant 0 : i32
    %c0_i32_0 = arith.constant 0 : i32
    return %arg0, %c0_i32 : i32, i32
  }
}

</mosaic_0001>

<bundles_post_ra>
// kernel: actor_forward.1
= control target key start
LH: loop header
LB: loop body
LE: loop exit
PB: predicated region body
PF: predicated region fallthrough
CT: control target
= control target key end

     0   :  { %10 = vsyncpa [#allocation3], 0  ;;  %s944_s0 = inlined_call_operand.vmem [shape: bf16[8,16], index: 0, kind: input, shape index: {}]   ;;  %s945_s1 = inlined_call_operand.hbm [shape: bf16[16,256], index: 1, kind: input, shape index: {}]   ;;  %s946_s2 = inlined_call_operand.hbm [shape: bf16[256,256], index: 2, kind: input, shape index: {}]   ;;  %s947_s3 = inlined_call_operand.hbm [shape: bf16[256,128], index: 3, kind: input, shape index: {}]   ;;  %s948_s4 = inlined_call_operand.vmem [shape: f32[3,256], index: 4, kind: input, shape index: {}]   ;;  %s949_s5 = inlined_call_operand.vmem [shape: bf16[8,128], index: 5, kind: output, shape index: {}]  }
   0x1   :  { %11 = vsyncpa [#allocation5], 0  ;;  %s31_s20 = sshll.u32 %s946_s2, 4  ;;  %s881_s21 = smov [#allocation4]   ;;  %s32_s20 = int_to_ptr.hbm [resolvable:$true] %s31_s20 }
   0x2   :  { %s33_s22 = sshll.u32 %s881_s21, 4  ;;  %s18_s25 = sshll.u32 %s945_s1, 4  ;;  %s34_s22 = int_to_ptr.vmem [resolvable:$true] %s33_s22  ;;  %s19_s25 = int_to_ptr.hbm [resolvable:$true] %s18_s25 }
   0x3   :  { %s882_s26 = smov 128   ;;  %s883_s27 = smov 8  }
   0x4   :  { %39 = dma.hbm_to_vmem [thread:$0]  %s32_s20, 4096, %s34_s22, [#allocation5], %s882_s26, %s882_s26, %s883_s27  }
   0x5   :  { %s884_s28 = smov [#allocation2]   ;;  %s44_s7 = sshll.u32 %s947_s3, 4  ;;  %s45_s7 = int_to_ptr.hbm [resolvable:$true] %s44_s7 }
   0x6   :  { %s20_s29 = sshll.u32 %s884_s28, 4  ;;  %s885_s2 = smov [#allocation6]   ;;  %s21_s29 = int_to_ptr.vmem [resolvable:$true] %s20_s29 }
   0x7   :  { %26 = dma.hbm_to_vmem [thread:$0]  %s19_s25, 256, %s21_s29, [#allocation3], %s882_s26, %s882_s26, %s883_s27  }
   0x8   :  { %s46_s8 = sshll.u32 %s885_s2, 4  ;;  %s886_s9 = smov 64   ;;  %s47_s8 = int_to_ptr.vmem [resolvable:$true] %s46_s8 }
   0x9   :  { %s887_s10 = smov 4  }
   0xa   :  { %52 = dma.hbm_to_vmem [thread:$0]  %s45_s7, 2048, %s47_s8, [#allocation5], %s886_s9, %s886_s9, %s887_s10  }
   0xb   :  { %877 = dma.done.wait [#allocation3], 256  }
   0xc   :  { %878 = vsyncadd [#allocation3], 4294967040 }
   0xd   :  { %879 = dma.done.wait [#allocation5], 6144  }
   0xe   :  { %880 = vsyncadd [#allocation5], 4294961152  ;;  %vm87_vm0 = vcmask 130048   ;;  %v544_v0 = vld [vmem:[#allocation2] sm:$0xf] }
   0xf   :  { %v746_v1 = vld [vmem:[#allocation2 + $0x4] sm:$0xf0]  ;;  %v745_v2 = vld [vmem:[#allocation2 + $0x4] sm:$0xf]  ;;  %v546_v4 = vld [vmem:[#allocation2 + $0x8] sm:$0xf0] }
  0x10   :  { %v545_v3 = vor.u32 %v746_v1, %v544_v0  ;;  %v68_v5 = vld [vmem:[%s944_s0] sm:$0xf]  ;;  %v549_v7 = vor.u32 %v745_v2, %v546_v4  ;;  %v762_v8 = vld [vmem:[#allocation4 + $0x74] sm:$0xf0]  ;;  %v761_v13 = vld [vmem:[#allocation4 + $0x74] sm:$0xf] }
  0x11   :  { %v611_v6 = vld [vmem:[#allocation4 + $0x70] sm:$0xf]  ;;  %v778_v10 = vld [vmem:[#allocation4 + $0xf4] sm:$0xf0]  ;;  %v613_v14 = vld [vmem:[#allocation4 + $0x78] sm:$0xf0] }
  0x12   :  { %v675_v9 = vld [vmem:[#allocation4 + $0xf0] sm:$0xf]  ;;  %98 = vmatpush.bf16.msra.mxu0 %v545_v3  ;;  %v612_v11 = vor.u32 %v762_v8, %v611_v6  ;;  %v777_v15 = vld [vmem:[#allocation4 + $0xf4] sm:$0xf]  ;;  %111 = vmatpush.bf16.msra.mxu1 %v549_v7  ;;  %v616_v16 = vor.u32 %v761_v13, %v613_v14  ;;  %v677_v17 = vld [vmem:[#allocation4 + $0xf8] sm:$0xf0] }
  0x13   :  { %v676_v12 = vor.u32 %v778_v10, %v675_v9  ;;  %v603_v18 = vld [vmem:[#allocation4 + $0x60] sm:$0xf]  ;;  %v760_v19 = vld [vmem:[#allocation4 + $0x64] sm:$0xf0]  ;;  %v680_v20 = vor.u32 %v777_v15, %v677_v17  ;;  %v759_v24 = vld [vmem:[#allocation4 + $0x64] sm:$0xf] }
  0x14   :  { %320 = vmatpush.bf16.msra.mxu2 %v612_v11  ;;  %v604_v21 = vor.u32 %v760_v19, %v603_v18  ;;  %v667_v22 = vld [vmem:[#allocation4 + $0xe0] sm:$0xf]  ;;  %v776_v23 = vld [vmem:[#allocation4 + $0xe4] sm:$0xf0]  ;;  %v605_v26 = vld [vmem:[#allocation4 + $0x68] sm:$0xf0] }
  0x15   :  { %333 = vmatpush.bf16.msra.mxu3 %v676_v12  ;;  %550 = vmatmul.msk.bf16.vlgmr.msra.gmra.mxu0 %vm87_vm0, %v68_v5  ;;  %v668_v25 = vor.u32 %v776_v23, %v667_v22  ;;  %v775_v27 = vld [vmem:[#allocation4 + $0xe4] sm:$0xf]  ;;  %v669_v28 = vld [vmem:[#allocation4 + $0xe8] sm:$0xf0]  ;;  %v608_v29 = vor.u32 %v759_v24, %v605_v26  ;;  %v595_v30 = vld [vmem:[#allocation4 + $0x50] sm:$0xf] }
  0x16   :  { %551 = vmatmul.msk.bf16.vlgmr.msra.gmra.mxu1 %vm87_vm0, %v68_v5  ;;  %346 = vmatpush.bf16.msrb.mxu0 %v616_v16  ;;  %v758_v31 = vld [vmem:[#allocation4 + $0x54] sm:$0xf0]  ;;  %v659_v32 = vld [vmem:[#allocation4 + $0xd0] sm:$0xf]  ;;  %v672_v33 = vor.u32 %v775_v27, %v669_v28  ;;  %v757_v35 = vld [vmem:[#allocation4 + $0x54] sm:$0xf] }
  0x17   :  { %359 = vmatpush.bf16.msrb.mxu1 %v680_v20  ;;  %v774_v34 = vld [vmem:[#allocation4 + $0xd4] sm:$0xf0]  ;;  %v597_v36 = vld [vmem:[#allocation4 + $0x58] sm:$0xf0]  ;;  %v596_v37 = vor.u32 %v758_v31, %v595_v30  ;;  %v773_v39 = vld [vmem:[#allocation4 + $0xd4] sm:$0xf] }
  0x18   :  { %321 = vmatpush.bf16.msra.mxu2 %v604_v21  ;;  %v660_v38 = vor.u32 %v774_v34, %v659_v32  ;;  %v661_v40 = vld [vmem:[#allocation4 + $0xd8] sm:$0xf0]  ;;  %v587_v41 = vld [vmem:[#allocation4 + $0x40] sm:$0xf]  ;;  %v756_v42 = vld [vmem:[#allocation4 + $0x44] sm:$0xf0]  ;;  %v600_v45 = vor.u32 %v757_v35, %v597_v36 }
  0x19   :  { %334 = vmatpush.bf16.msra.mxu3 %v668_v25  ;;  %v651_v43 = vld [vmem:[#allocation4 + $0xc0] sm:$0xf]  ;;  %v772_v44 = vld [vmem:[#allocation4 + $0xc4] sm:$0xf0]  ;;  %v664_v46 = vor.u32 %v773_v39, %v661_v40  ;;  %v755_v47 = vld [vmem:[#allocation4 + $0x44] sm:$0xf]  ;;  %v588_v49 = vor.u32 %v756_v42, %v587_v41 }
  0x1a   :  { %347 = vmatpush.bf16.msrb.mxu0 %v608_v29  ;;  %v589_v48 = vld [vmem:[#allocation4 + $0x48] sm:$0xf0]  ;;  %v652_v50 = vor.u32 %v772_v44, %v651_v43  ;;  %v771_v51 = vld [vmem:[#allocation4 + $0xc4] sm:$0xf]  ;;  %v579_v53 = vld [vmem:[#allocation4 + $0x30] sm:$0xf] }
  0x1b   :  { %360 = vmatpush.bf16.msrb.mxu1 %v672_v33  ;;  %v653_v52 = vld [vmem:[#allocation4 + $0xc8] sm:$0xf0]  ;;  %v754_v54 = vld [vmem:[#allocation4 + $0x34] sm:$0xf0]  ;;  %v643_v55 = vld [vmem:[#allocation4 + $0xb0] sm:$0xf]  ;;  %v592_v57 = vor.u32 %v755_v47, %v589_v48 }
  0x1c   :  { %322 = vmatpush.bf16.msra.mxu2 %v596_v37  ;;  %v770_v56 = vld [vmem:[#allocation4 + $0xb4] sm:$0xf0]  ;;  %v656_v58 = vor.u32 %v771_v51, %v653_v52  ;;  %v753_v59 = vld [vmem:[#allocation4 + $0x34] sm:$0xf]  ;;  %v581_v60 = vld [vmem:[#allocation4 + $0x38] sm:$0xf0]  ;;  %v580_v62 = vor.u32 %v754_v54, %v579_v53 }
  0x1d   :  { %335 = vmatpush.bf16.msra.mxu3 %v660_v38  ;;  %v769_v61 = vld [vmem:[#allocation4 + $0xb4] sm:$0xf]  ;;  %v644_v63 = vor.u32 %v770_v56, %v643_v55  ;;  %v645_v0 = vld [vmem:[#allocation4 + $0xb8] sm:$0xf0]  ;;  %v571_v1 = vld [vmem:[#allocation4 + $0x20] sm:$0xf]  ;;  %v584_v5 = vor.u32 %v753_v59, %v581_v60 }
  0x1e   :  { %348 = vmatpush.bf16.msrb.mxu0 %v600_v45  ;;  %v752_v2 = vld [vmem:[#allocation4 + $0x24] sm:$0xf0]  ;;  %v635_v3 = vld [vmem:[#allocation4 + $0xa0] sm:$0xf]  ;;  %v648_v6 = vor.u32 %v769_v61, %v645_v0  ;;  %v751_v7 = vld [vmem:[#allocation4 + $0x24] sm:$0xf] }
  0x1f   :  { %361 = vmatpush.bf16.msrb.mxu1 %v664_v46  ;;  %v768_v4 = vld [vmem:[#allocation4 + $0xa4] sm:$0xf0]  ;;  %v573_v8 = vld [vmem:[#allocation4 + $0x28] sm:$0xf0]  ;;  %v572_v9 = vor.u32 %v752_v2, %v571_v1  ;;  %v767_v11 = vld [vmem:[#allocation4 + $0xa4] sm:$0xf] }
  0x20   :  { %323 = vmatpush.bf16.msra.mxu2 %v588_v49  ;;  %v636_v10 = vor.u32 %v768_v4, %v635_v3  ;;  %v637_v12 = vld [vmem:[#allocation4 + $0xa8] sm:$0xf0]  ;;  %v576_v13 = vor.u32 %v751_v7, %v573_v8  ;;  %v563_v15 = vld [vmem:[#allocation4 + $0x10] sm:$0xf]  ;;  %v750_v16 = vld [vmem:[#allocation4 + $0x14] sm:$0xf0] }
  0x21   :  { %336 = vmatpush.bf16.msra.mxu3 %v652_v50  ;;  %v640_v14 = vor.u32 %v767_v11, %v637_v12  ;;  %v627_v17 = vld [vmem:[#allocation4 + $0x90] sm:$0xf]  ;;  %v564_v18 = vor.u32 %v750_v16, %v563_v15  ;;  %v766_v19 = vld [vmem:[#allocation4 + $0x94] sm:$0xf0]  ;;  %v749_v20 = vld [vmem:[#allocation4 + $0x14] sm:$0xf] }
  0x22   :  { %349 = vmatpush.bf16.msrb.mxu0 %v592_v57  ;;  %v565_v21 = vld [vmem:[#allocation4 + $0x18] sm:$0xf0]  ;;  %v628_v22 = vor.u32 %v766_v19, %v627_v17  ;;  %v765_v24 = vld [vmem:[#allocation4 + $0x94] sm:$0xf]  ;;  %v555_v27 = vld [vmem:[#allocation4] sm:$0xf] }
  0x23   :  { %362 = vmatpush.bf16.msrb.mxu1 %v656_v58  ;;  %v568_v23 = vor.u32 %v749_v20, %v565_v21  ;;  %v629_v25 = vld [vmem:[#allocation4 + $0x98] sm:$0xf0]  ;;  %v748_v28 = vld [vmem:[#allocation4 + $0x4] sm:$0xf0]  ;;  %v619_v29 = vld [vmem:[#allocation4 + $0x80] sm:$0xf] }
  0x24   :  { %324 = vmatpush.bf16.msra.mxu2 %v580_v62  ;;  %v632_v26 = vor.u32 %v765_v24, %v629_v25  ;;  %v556_v30 = vor.u32 %v748_v28, %v555_v27  ;;  %v764_v31 = vld [vmem:[#allocation4 + $0x84] sm:$0xf0]  ;;  %v747_v32 = vld [vmem:[#allocation4 + $0x4] sm:$0xf]  ;;  %v557_v33 = vld [vmem:[#allocation4 + $0x8] sm:$0xf0] }
  0x25   :  { %337 = vmatpush.bf16.msra.mxu3 %v644_v63  ;;  %v620_v34 = vor.u32 %v764_v31, %v619_v29  ;;  %v560_v35 = vor.u32 %v747_v32, %v557_v33  ;;  %v763_v36 = vld [vmem:[#allocation4 + $0x84] sm:$0xf]  ;;  %v621_v37 = vld [vmem:[#allocation4 + $0x88] sm:$0xf0]  ;;  %v794_v39 = vld [vmem:[#allocation6 + $0x78] sm:$0xff] }
  0x26   :  { %350 = vmatpush.bf16.msrb.mxu0 %v584_v5  ;;  %v624_v38 = vor.u32 %v763_v36, %v621_v37  ;;  %v786_v40 = vld [vmem:[#allocation6 + $0x38] sm:$0xff]  ;;  %v793_v41 = vld [vmem:[#allocation6 + $0x70] sm:$0xff]  ;;  %v792_v43 = vld [vmem:[#allocation6 + $0x68] sm:$0xff] }
  0x27   :  { %363 = vmatpush.bf16.msrb.mxu1 %v648_v6  ;;  %v785_v42 = vld [vmem:[#allocation6 + $0x30] sm:$0xff]  ;;  %v784_v44 = vld [vmem:[#allocation6 + $0x28] sm:$0xff]  ;;  %v791_v45 = vld [vmem:[#allocation6 + $0x60] sm:$0xff] }
  0x28   :  { %325 = vmatpush.bf16.msra.mxu2 %v572_v9  ;;  %v783_v46 = vld [vmem:[#allocation6 + $0x20] sm:$0xff]  ;;  %v790_v47 = vld [vmem:[#allocation6 + $0x58] sm:$0xff]  ;;  %v71_v48 = vld [vmem:[%s948_s4] ss:$4 sm:$0x3] }
  0x29   :  { %338 = vmatpush.bf16.msra.mxu3 %v636_v10  ;;  %v789_v49 = vld [vmem:[#allocation6 + $0x50] sm:$0xff]  ;;  %v73_v50 = vperm.slane %v71_v48, 0  ;;  %v74_v51 = vperm.slane %v71_v48, 1  ;;  %v782_v62 = vld [vmem:[#allocation6 + $0x18] sm:$0xff]  ;;  %v788_v63 = vld [vmem:[#allocation6 + $0x48] sm:$0xff] }
  0x2a   :  { %351 = vmatpush.bf16.msrb.mxu0 %v576_v13  ;;  %v781_v0 = vld [vmem:[#allocation6 + $0x10] sm:$0xff]  ;;  %v787_v1 = vld [vmem:[#allocation6 + $0x40] sm:$0xff]  ;;  %v780_v2 = vld [vmem:[#allocation6 + $0x8] sm:$0xff] }
  0x2b   :  { %364 = vmatpush.bf16.msrb.mxu1 %v640_v14  ;;  %v779_v3 = vld [vmem:[#allocation6] sm:$0xff]  ;;  %v552_v4 = vld [vmem:[%s948_s4 + $0x1] ss:$4 sm:$0x3]  ;;  %v802_v24 = vld [vmem:[%s948_s4 + $0x2] ss:$0 sm:$0xff] }
  0x2c   :  { %326 = vmatpush.bf16.msra.mxu2 %v564_v18  ;;  %v157_v5 = vperm.slane %v552_v4, 1  ;;  %v156_v10 = vperm.slane %v552_v4, 0 }
  0x2d   :  { %339 = vmatpush.bf16.msra.mxu3 %v628_v22 }
  0x2e   :  { %352 = vmatpush.bf16.msrb.mxu0 %v568_v23 }
  0x2f   :  { %365 = vmatpush.bf16.msrb.mxu1 %v632_v26 }
  0x30   :  { %327 = vmatpush.bf16.msra.mxu2 %v556_v30 }
  0x31   :  { %340 = vmatpush.bf16.msra.mxu3 %v620_v34 }
  0x32   :  { %353 = vmatpush.bf16.msrb.mxu0 %v560_v35 }
  0x33   :  { %366 = vmatpush.bf16.msrb.mxu1 %v624_v38 }
  0x34   :  { %506 = vmatpush.bf16.msrb.mxu2 %v786_v40 }
  0x35   :  { %519 = vmatpush.bf16.msrb.mxu3 %v794_v39 }
  0x38   :  { %507 = vmatpush.bf16.msrb.mxu2 %v785_v42 }
  0x39   :  { %520 = vmatpush.bf16.msrb.mxu3 %v793_v41 }
  0x3c   :  { %508 = vmatpush.bf16.msrb.mxu2 %v784_v44 }
  0x3d   :  { %521 = vmatpush.bf16.msrb.mxu3 %v792_v43 }
  0x40   :  { %509 = vmatpush.bf16.msrb.mxu2 %v783_v46 }
  0x41   :  { %522 = vmatpush.bf16.msrb.mxu3 %v791_v45 }
  0x44   :  { %510 = vmatpush.bf16.msrb.mxu2 %v782_v62 }
  0x45   :  { %523 = vmatpush.bf16.msrb.mxu3 %v790_v47 }
  0x48   :  { %511 = vmatpush.bf16.msrb.mxu2 %v781_v0 }
  0x49   :  { %524 = vmatpush.bf16.msrb.mxu3 %v789_v49 }
  0x4c   :  { %512 = vmatpush.bf16.msrb.mxu2 %v780_v2 }
  0x4d   :  { %525 = vmatpush.bf16.msrb.mxu3 %v788_v63 }
  0x50   :  { %513 = vmatpush.bf16.msrb.mxu2 %v779_v3 }
  0x51   :  { %526 = vmatpush.bf16.msrb.mxu3 %v787_v1 }
  0x92   :  { %v100_v52 = vpop.f32.mrf.mxu0 }
  0x93   :  { %v101_v53 = vadd.f32 %v100_v52, %v73_v50  ;;  %v113_v54 = vpop.f32.mrf.mxu1 }
  0x94   :  { %v114_v55 = vadd.f32 %v113_v54, %v74_v51 }
  0x95   :  { %v117_v56 = vmax.f32 %v101_v53, 0.0 }
  0x96   :  { %v118_v57 = vmax.f32 %v114_v55, 0.0 }
  0x97   :  { %v119_v58 = vpack.c.bf16 %v117_v56, %v117_v56 }
  0x98   :  { %v120_v59 = vpack.c.bf16 %v118_v57, %v118_v57 }
  0x99   :  { %328 = vmatmul.bf16.vlgmr.msra.gmra.mxu2 %v119_v58  ;;  %354 = vmatmul.bf16.vlgmr.msrb.gmra.mxu0 %v119_v58 }
  0x9a   :  { %341 = vmatmul.bf16.vlgmr.msra.gmra.mxu3 %v120_v59  ;;  %367 = vmatmul.bf16.vlgmr.msrb.gmra.mxu1 %v120_v59  ;;  %v102_v60 = vpop.f32.mrf.mxu0 }
  0x9b   :  { %v115_v61 = vpop.f32.mrf.mxu1 }
 0x116   :  { %v355_v6 = vpop.f32.mrf.mxu0 }
 0x117   :  { %v356_v7 = vadd.f32 %v355_v6, %v157_v5  ;;  %v368_v8 = vpop.f32.mrf.mxu1 }
 0x119   :  { %v369_v9 = vadd.f32 %v368_v8, %v356_v7 }
 0x11b   :  { %v373_v11 = vmax.f32 %v369_v9, 0.0 }
 0x11c   :  { %v329_v12 = vpop.f32.mrf.mxu2 }
 0x11d   :  { %v375_v13 = vpack.c.bf16 %v373_v11, %v373_v11  ;;  %v330_v14 = vadd.f32 %v329_v12, %v156_v10  ;;  %v342_v15 = vpop.f32.mrf.mxu3 }
 0x11e   :  { %v357_v16 = vpop.f32.mrf.mxu0 }
 0x11f   :  { %v343_v17 = vadd.f32 %v342_v15, %v330_v14  ;;  %v370_v18 = vpop.f32.mrf.mxu1  ;;  %527 = vmatmul.bf16.vlgmr.msrb.gmra.mxu3 %v375_v13 }
 0x121   :  { %v372_v19 = vmax.f32 %v343_v17, 0.0 }
 0x123   :  { %v374_v20 = vpack.c.bf16 %v372_v19, %v372_v19 }
 0x124   :  { %v331_v21 = vpop.f32.mrf.mxu2 }
 0x125   :  { %v344_v22 = vpop.f32.mrf.mxu3  ;;  %514 = vmatmul.bf16.vlgmr.msrb.gmra.mxu2 %v374_v20 }
 0x1a2   :  { %v528_v23 = vpop.f32.mrf.mxu3 }
 0x1a8   :  { %v515_v25 = vpop.f32.mrf.mxu2 }
 0x1a9   :  { %v516_v26 = vadd.f32 %v802_v24, %v515_v25 }
 0x1aa   :  { %v530_v27 = vpop.f32.mrf.mxu3 }
 0x1ab   :  { %v529_v28 = vadd.f32 %v528_v23, %v516_v26 }
 0x1ad   :  { %803 = vtanh.f32 %v529_v28 }
 0x1b0   :  { %v517_v29 = vpop.f32.mrf.mxu2 }
 0x1b3   :  { %v804_v30 = vpop.eup %803 }
 0x1b4   :  { %v533_v31 = vmul.f32 2.0, %v804_v30 }
 0x1b6   :  { %v534_v32 = vpack.c.bf16 %v533_v31, %v533_v31 }
 0x1b8   :  { %535 = vst [vmem:[%s949_s5] sm:$0xf] %v534_v32 }
 0x1b9   :  { %540 = vsyncpa [#allocation3], 1 }
 0x1ba   :  { %541 = vsyncpa [#allocation5], 1 }

</bundles_post_ra>
